<compile_context>
chip_gen: v7x
topology: tpu7x:2x2x1
jax: 0.10.0
libtpu: 0.0.40
codegen_flags: <defaults>
</compile_context>

<pallas_src>
import functools

import jax
import jax.numpy as jnp
from jax.experimental import pallas as pl
from jax.experimental.pallas import tpu as pltpu

_LANE = 128
_SUBLANE = 8


def _round_up(x, m):
    return ((x + m - 1) // m) * m


def _parallel_table_kernel(x0_ref, params_ref, pm_ref, x2_ref,
                           o0_ref, o1_ref, o2_ref, *, conv_row):
    f32 = jnp.float32
    din = x0_ref.shape[1]
    B, cout, HW = o1_ref.shape
    kk = pm_ref.shape[0]

    # ---- branch 0: Linear(Din, Dout) ---------------------------------------------
    # Weight rows [0:din], bias row [din] of the constant slab; Dout padded to 128
    # lanes once at init -> unmasked 128-lane stores.
    w0 = params_ref[0:din, :]                                   # (Din, 128)
    b0 = params_ref[din:din + 1, :]                             # (1, 128)
    y0 = jnp.dot(x0_ref[...], w0, preferred_element_type=f32) + b0
    o0_ref[...] = y0.astype(o0_ref.dtype)

    # ---- branch 1: Conv2d via pre-built im2col patches ----------------------------
    # Canonical (M,K)x(K,N): (Cout, KK) · (KK, B*HW) feeds the MXU directly (no A·Bᵀ
    # operand transpose).  Bias is added exactly on the VPU, outside the MXU.
    wcb = params_ref[conv_row:conv_row + cout, :]               # (Cout, 128) dense, 8-aligned
    wc, bc = wcb[:, :kk], wcb[:, kk:kk + 1]                     # (Cout, KK), (Cout, 1)
    y1 = jnp.dot(wc, pm_ref[...], preferred_element_type=f32) + bc   # (Cout, B*HW)
    # Per-batch stores are lane-aligned (HW = 256 is a multiple of 128); NCHW is a free
    # reshape in the wrapper, so no output transpose is needed.
    for b in range(B):
        o1_ref[b] = y1[:, b * HW:(b + 1) * HW].astype(o1_ref.dtype)

    # ---- branch 2: ReLU -------------------------------------------------------------
    o2_ref[...] = jnp.maximum(x2_ref[...], 0.0).astype(o2_ref.dtype)


class ParallelTable:
    """Fused Pallas implementation of
    ParallelTable([nn.Linear(32, 64), nn.Conv2d(4, 8, 3, padding=1), nn.ReLU()]).

    forward(x) == [linear(x[0]), conv(x[1]), relu(x[2])]  (PyTorch semantics),
    executed as a single pallas_call.
    """

    def __init__(self, w_lin, b_lin, w_conv, b_conv, padding=1):
        # --- one-time parameter preprocessing (hoisted off the forward path) ---
        self.dout, self.din = w_lin.shape
        self.dout_p = _round_up(self.dout, _LANE)                # 64 -> 128 lanes
        self.cout, self.cin, self.kh, self.kw = w_conv.shape
        self.kk = self.kh * self.kw * self.cin                   # im2col K (=36)
        self.pad = padding

        # One lane-dense f32 constant slab; conv rows start sublane-aligned.
        self.conv_row = _round_up(self.din + 1, _SUBLANE)        # 40
        n_rows = _round_up(self.conv_row + self.cout, _SUBLANE)  # 48
        lanes = max(self.dout_p, _round_up(self.kk + 1, _LANE))  # 128
        p = jnp.zeros((n_rows, lanes), jnp.float32)
        p = p.at[:self.din, :self.dout].set(jnp.asarray(w_lin, jnp.float32).T)
        p = p.at[self.din, :self.dout].set(jnp.asarray(b_lin, jnp.float32))
        # OIHW -> (Cout, KH*KW*Cin); reduction axis ordered (kh, kw, c) to match im2col.
        wc = jnp.transpose(jnp.asarray(w_conv, jnp.float32),
                           (0, 2, 3, 1)).reshape(self.cout, self.kk)
        p = p.at[self.conv_row:self.conv_row + self.cout, :self.kk].set(wc)
        p = p.at[self.conv_row:self.conv_row + self.cout, self.kk].set(
            jnp.asarray(b_conv, jnp.float32))
        self.params = p

        self._fwd = jax.jit(self._forward)

    def _forward(self, x0, x1, x2):
        B, Cin, H, W = x1.shape
        HW = H * W
        KH, KW, p = self.kh, self.kw, self.pad

        # Wrapper-side im2col (hoisted out of the kernel): lane-dense (KH*KW*Cin, B*HW)
        # patch matrix, reduction axis ordered (kh, kw, c) to match the packed conv weight.
        xp = jnp.pad(x1, ((0, 0), (0, 0), (p, p), (p, p)))
        taps = [xp[:, :, kh:kh + H, kw:kw + W] for kh in range(KH) for kw in range(KW)]
        pm = jnp.stack(taps, axis=0)                             # (KH*KW, B, Cin, H, W)
        pm = pm.transpose(0, 2, 1, 3, 4).reshape(KH * KW * Cin, B * HW)

        x2f = x2.reshape(x2.shape[0], -1)                        # (2, 128) lane-dense view

        flops = (2 * x0.shape[0] * self.din * self.dout_p        # linear matmul
                 + 2 * self.cout * self.kk * B * HW              # conv matmul
                 + x2f.size)                                     # relu
        bytes_accessed = 4 * (x0.size + self.params.size + pm.size + x2f.size
                              + x0.shape[0] * self.dout_p + B * self.cout * HW + x2f.size)

        vmem = pl.BlockSpec(memory_space=pltpu.MemorySpace.VMEM)  # whole-array, no grid
        o0, o1, o2 = pl.pallas_call(
            functools.partial(_parallel_table_kernel, conv_row=self.conv_row),
            out_shape=(
                jax.ShapeDtypeStruct((x0.shape[0], self.dout_p), jnp.float32),
                jax.ShapeDtypeStruct((B, self.cout, HW), jnp.float32),
                jax.ShapeDtypeStruct(x2f.shape, jnp.float32),
            ),
            in_specs=[vmem, vmem, vmem, vmem],
            out_specs=(vmem, vmem, vmem),
            cost_estimate=pl.CostEstimate(flops=flops, transcendentals=0,
                                          bytes_accessed=bytes_accessed),
            # NOTE(v7x scaling): if conv batch grows, switch to a batch grid axis with
            # Blocked specs + dimension_semantics=("parallel",) to bound VMEM and use both
            # TensorCores; at B=2 this single no-grid launch is launch-overhead bound.
        )(x0, self.params, pm, x2f)

        y0 = o0[:, :self.dout]                    # drop lane padding
        y1 = o1.reshape(B, self.cout, H, W)       # (B, Cout, HW) -> NCHW, free reshape
        y2 = o2.reshape(x2.shape)
        return [y0, y1, y2]

    def __call__(self, x):
        return self._fwd(*x)


if __name__ == "__main__":
    key = jax.random.PRNGKey(0)
    k_x0, k_x1, k_x2, k_w0, k_b0, k_w1, k_b1 = jax.random.split(key, 7)

    # ---- deterministic parameters (shapes from the sub-module __init__s) ----
    Din, Dout = 32, 64
    w0 = jax.random.normal(k_w0, (Dout, Din), jnp.float32) * 0.05     # Linear weight (out, in)
    b0 = jax.random.normal(k_b0, (Dout,), jnp.float32) * 0.05
    Cin, Cout, K = 4, 8, 3
    w1 = jax.random.normal(k_w1, (Cout, Cin, K, K), jnp.float32) * 0.1  # Conv2d OIHW
    b1 = jax.random.normal(k_b1, (Cout,), jnp.float32) * 0.1

    table = ParallelTable(w0, b0, w1, b1, padding=1)

    # ---- deterministic example inputs (one per parallel branch) ----
    x0 = jax.random.normal(k_x0, (2, 32), jnp.float32)                # for Linear
    x1 = jax.random.normal(k_x1, (2, 4, 16, 16), jnp.float32)         # NCHW, for Conv2d
    x2 = jax.random.normal(k_x2, (2, 8, 16), jnp.float32)             # for ReLU

    y = table([x0, x1, x2])
    y = [jax.block_until_ready(yi) for yi in y]

    # ---- pure-JAX reference check ----
    ref0 = x0 @ w0.T + b0
    ref1 = jax.lax.conv_general_dilated(
        x1, w1, window_strides=(1, 1), padding="SAME",
        dimension_numbers=("NCHW", "OIHW", "NCHW"),
    ) + b1.reshape(1, Cout, 1, 1)
    ref2 = jnp.maximum(x2, 0)

    assert y[0].shape == (2, 64) and y[1].shape == (2, 8, 16, 16) and y[2].shape == (2, 8, 16)
    assert jnp.allclose(y[0], ref0, atol=1e-4, rtol=1e-4)
    assert jnp.allclose(y[1], ref1, atol=1e-4, rtol=1e-4)
    assert jnp.allclose(y[2], ref2, atol=1e-6)

    print("KERNEL_OK")
</pallas_src>

<mosaic_0001>
module attributes {stable_mosaic.version = 11 : i64} {
  func.func @_parallel_table_kernel(%arg0: memref<2x32xf32, #tpu.memory_space<vmem>>, %arg1: memref<48x128xf32, #tpu.memory_space<vmem>>, %arg2: memref<36x512xf32, #tpu.memory_space<vmem>>, %arg3: memref<2x128xf32, #tpu.memory_space<vmem>>, %arg4: memref<2x128xf32, #tpu.memory_space<vmem>>, %arg5: memref<2x8x256xf32, #tpu.memory_space<vmem>>, %arg6: memref<2x128xf32, #tpu.memory_space<vmem>>) attributes {dimension_semantics = [], scalar_prefetch = 0 : i64, scratch_operands = 0 : i64, tpu.core_type = #tpu.core_type<tc>} {
    %c0 = arith.constant 0 : index
    %c0_0 = arith.constant 0 : index
    %0 = vector.load %arg1[%c0, %c0_0] : memref<48x128xf32, #tpu.memory_space<vmem>>, vector<32x128xf32>
    %c32 = arith.constant 32 : index
    %c0_1 = arith.constant 0 : index
    %1 = vector.load %arg1[%c32, %c0_1] : memref<48x128xf32, #tpu.memory_space<vmem>>, vector<1x128xf32>
    %c0_2 = arith.constant 0 : index
    %c0_3 = arith.constant 0 : index
    %2 = vector.load %arg0[%c0_2, %c0_3] : memref<2x32xf32, #tpu.memory_space<vmem>>, vector<2x32xf32>
    %cst = arith.constant dense<0.000000e+00> : vector<2x128xf32>
    %3 = tpu.matmul %2, %0, %cst {dimension_numbers = #tpu.dot_dimension_numbers<[1], [0], [0], [1], [0, 0, 1, 1], [], []>} : vector<2x32xf32>, vector<32x128xf32>, vector<2x128xf32> -> vector<2x128xf32>
    %4 = vector.broadcast %1 : vector<1x128xf32> to vector<2x128xf32>
    %5 = arith.addf %3, %4 : vector<2x128xf32>
    %c0_4 = arith.constant 0 : index
    %c0_5 = arith.constant 0 : index
    %6 = vector.load %arg4[%c0_4, %c0_5] : memref<2x128xf32, #tpu.memory_space<vmem>>, vector<2x128xf32>
    tpu.vector_store %arg4[%c0_4, %c0_5], %5 {strides = array<i32>} : memref<2x128xf32, #tpu.memory_space<vmem>>, vector<2x128xf32>,
    %c40 = arith.constant 40 : index
    %c0_6 = arith.constant 0 : index
    %7 = vector.load %arg1[%c40, %c0_6] : memref<48x128xf32, #tpu.memory_space<vmem>>, vector<8x128xf32>
    %8 = vector.extract_strided_slice %7 {offsets = [0, 0], sizes = [8, 36], strides = [1, 1]} : vector<8x128xf32> to vector<8x36xf32>
    %9 = vector.extract_strided_slice %7 {offsets = [0, 36], sizes = [8, 1], strides = [1, 1]} : vector<8x128xf32> to vector<8x1xf32>
    %c0_7 = arith.constant 0 : index
    %c0_8 = arith.constant 0 : index
    %10 = vector.load %arg2[%c0_7, %c0_8] : memref<36x512xf32, #tpu.memory_space<vmem>>, vector<36x512xf32>
    %cst_9 = arith.constant dense<0.000000e+00> : vector<8x512xf32>
    %11 = tpu.matmul %8, %10, %cst_9 {dimension_numbers = #tpu.dot_dimension_numbers<[1], [0], [0], [1], [0, 0, 1, 1], [], []>} : vector<8x36xf32>, vector<36x512xf32>, vector<8x512xf32> -> vector<8x512xf32>
    %12 = vector.broadcast %9 : vector<8x1xf32> to vector<8x512xf32>
    %13 = arith.addf %11, %12 : vector<8x512xf32>
    %14 = vector.extract_strided_slice %13 {offsets = [0, 0], sizes = [8, 256], strides = [1, 1]} : vector<8x512xf32> to vector<8x256xf32>
    %c0_10 = arith.constant 0 : index
    %c0_11 = arith.constant 0 : index
    %c0_12 = arith.constant 0 : index
    %15 = vector.load %arg5[%c0_10, %c0_11, %c0_12] : memref<2x8x256xf32, #tpu.memory_space<vmem>>, vector<1x8x256xf32>
    %16 = vector.shape_cast %15 : vector<1x8x256xf32> to vector<8x256xf32>
    %17 = vector.shape_cast %14 : vector<8x256xf32> to vector<1x8x256xf32>
    tpu.vector_store %arg5[%c0_10, %c0_11, %c0_12], %17 {strides = array<i32>} : memref<2x8x256xf32, #tpu.memory_space<vmem>>, vector<1x8x256xf32>,
    %18 = vector.extract_strided_slice %13 {offsets = [0, 256], sizes = [8, 256], strides = [1, 1]} : vector<8x512xf32> to vector<8x256xf32>
    %c1 = arith.constant 1 : index
    %c0_13 = arith.constant 0 : index
    %c0_14 = arith.constant 0 : index
    %19 = vector.load %arg5[%c1, %c0_13, %c0_14] : memref<2x8x256xf32, #tpu.memory_space<vmem>>, vector<1x8x256xf32>
    %20 = vector.shape_cast %19 : vector<1x8x256xf32> to vector<8x256xf32>
    %21 = vector.shape_cast %18 : vector<8x256xf32> to vector<1x8x256xf32>
    tpu.vector_store %arg5[%c1, %c0_13, %c0_14], %21 {strides = array<i32>} : memref<2x8x256xf32, #tpu.memory_space<vmem>>, vector<1x8x256xf32>,
    %c0_15 = arith.constant 0 : index
    %c0_16 = arith.constant 0 : index
    %22 = vector.load %arg3[%c0_15, %c0_16] : memref<2x128xf32, #tpu.memory_space<vmem>>, vector<2x128xf32>
    %cst_17 = arith.constant 0.000000e+00 : f32
    %23 = vector.broadcast %cst_17 : f32 to vector<2x128xf32>
    %24 = arith.maximumf %22, %23 : vector<2x128xf32>
    %c0_18 = arith.constant 0 : index
    %c0_19 = arith.constant 0 : index
    %25 = vector.load %arg6[%c0_18, %c0_19] : memref<2x128xf32, #tpu.memory_space<vmem>>, vector<2x128xf32>
    tpu.vector_store %arg6[%c0_18, %c0_19], %24 {strides = array<i32>} : memref<2x128xf32, #tpu.memory_space<vmem>>, vector<2x128xf32>,
    return
  }
}

</mosaic_0001>

<bundles_post_ra>
// kernel: _forward.1
= control target key start
LH: loop header
LB: loop body
LE: loop exit
PB: predicated region body
PF: predicated region fallthrough
CT: control target
= control target key end

     0   :  { %v398_v3 = vmov 0.0|0.0   ;;  %vm399_vm0 = vmmov 0   ;;  %v400_v6 = vmov 0.0   ;;  %v401_v17 = vmov 36   ;;  %s553_s0 = inlined_call_operand.vmem [shape: f32[2,32], index: 0, kind: input, shape index: {}]   ;;  %s554_s1 = inlined_call_operand.vmem [shape: f32[48,128], index: 1, kind: input, shape index: {}]   ;;  %s555_s2 = inlined_call_operand.vmem [shape: f32[36,512], index: 2, kind: input, shape index: {}]   ;;  %s556_s3 = inlined_call_operand.vmem [shape: f32[2,128], index: 3, kind: input, shape index: {}]   ;;  %s557_s4 = inlined_call_operand.hbm [shape: f32[2,128], index: 4, kind: output, shape index: {0}]   ;;  %s558_s5 = inlined_call_operand.vmem [shape: f32[2,8,256], index: 5, kind: output, shape index: {1}]   ;;  %s559_s6 = inlined_call_operand.vmem [shape: f32[2,128], index: 6, kind: output, shape index: {2}]  }
   0x1   :  { %v21_v0 = vld [vmem:[%s554_s1] sm:$0xff]  ;;  %v22_v1 = vld [vmem:[%s554_s1 + $0x8] sm:$0xff]  ;;  %v23_v2 = vld [vmem:[%s554_s1 + $0x10] sm:$0xff]  ;;  %346 = vmatprep.subr.bf16.mxu0 %v398_v3  ;;  %343 = vmatprep.mubr.msk.f32.mxu0 %vm399_vm0, %v400_v6  ;;  %vm31_vm1 = vcmask 261120   ;;  %vm135_vm2 = vcmask 1043456  }
   0x2   :  { %v347_v4 = vpack.c.bf16 %v22_v1, %v21_v0  ;;  %v24_v5 = vld [vmem:[%s554_s1 + $0x18] sm:$0xff]  ;;  %v108_v7 = vld [vmem:[%s555_s2 + $0x8] sm:$0xff]  ;;  %v107_v10 = vld [vmem:[%s555_s2] sm:$0xff]  ;;  %212 = vmatprep.mubr.f32.mxu1 %v400_v6  ;;  %373 = vset.pattern.permute.xlu0 %v401_v17 }
   0x3   :  { %v112_v8 = vld [vmem:[%s555_s2 + $0x28] sm:$0xff]  ;;  %v111_v11 = vld [vmem:[%s555_s2 + $0x20] sm:$0xff]  ;;  %v350_v12 = vpack.c.bf16 %v24_v5, %v23_v2  ;;  %v110_v14 = vld [vmem:[%s555_s2 + $0x18] sm:$0xff] }
   0x4   :  { %v352_v9 = vpack.c.bf16 %v112_v8, %v108_v7  ;;  %348 = vmatpush3.bf16.msra.mxu0 %v347_v4  ;;  %v354_v13 = vpack.c.bf16 %v111_v11, %v107_v10  ;;  %v114_v15 = vld [vmem:[%s555_s2 + $0x38] sm:$0xff]  ;;  %v109_v16 = vld [vmem:[%s555_s2 + $0x10] sm:$0xff]  ;;  %v116_v20 = vld [vmem:[%s555_s2 + $0x48] sm:$0xff] }
   0x5   :  { %349 = vmatprep.subr.bf16.mxu0 %v398_v3  ;;  %v360_v18 = vpack.c.bf16 %v114_v15, %v110_v14  ;;  %v113_v19 = vld [vmem:[%s555_s2 + $0x30] sm:$0xff]  ;;  %v120_v21 = vld [vmem:[%s555_s2 + $0x68] sm:$0xff]  ;;  %v115_v23 = vld [vmem:[%s555_s2 + $0x40] sm:$0xff] }
   0x6   :  { %353 = vmatprep.subr.bf16.mxu1 %v352_v9  ;;  %v356_v22 = vpack.c.bf16 %v120_v21, %v116_v20  ;;  %v119_v24 = vld [vmem:[%s555_s2 + $0x60] sm:$0xff]  ;;  %v118_v25 = vld [vmem:[%s555_s2 + $0x58] sm:$0xff]  ;;  %v362_v29 = vpack.c.bf16 %v113_v19, %v109_v16  ;;  %v124_v30 = vld [vmem:[%s555_s2 + $0x88] sm:$0xf] }
   0x7   :  { %355 = vmatpush1.bf16.msra.mxu1 %v354_v13  ;;  %v358_v26 = vpack.c.bf16 %v119_v24, %v115_v23  ;;  %v122_v27 = vld [vmem:[%s555_s2 + $0x78] sm:$0xff]  ;;  %v26_v28 = vld [vmem:[%s553_s0] sm:$0x3]  ;;  %v117_v32 = vld [vmem:[%s555_s2 + $0x50] sm:$0xff] }
   0x8   :  { %351 = vmatpush3.bf16.msra.mxu0 %v350_v12  ;;  %357 = vmatprep.subr.bf16.mxu1 %v356_v22  ;;  %v364_v31 = vpack.c.bf16 %v122_v27, %v118_v25  ;;  %v121_v33 = vld [vmem:[%s555_s2 + $0x70] sm:$0xff]  ;;  %v106_v34 = vld [vmem:[%s554_s1 + $0x28] sm:$0xff] }
   0x9   :  { %361 = vmatprep.subr.bf16.mxu0 %v360_v18  ;;  %129 = vperm.xlu0 %373, %v106_v34  }
   0xb   :  { %359 = vmatpush1.bf16.msra.mxu1 %v358_v26 }
   0xc   :  { %12 = vsyncpa [#allocation3], 0  ;;  %344 = vmatmul.mubr.msk.f32.vlgmr.msra.gmra.mrb[0].mxu0 %vm31_vm1, %v26_v28  ;;  %322 = vmatprep.subr.msk.mxu1 %vm135_vm2, %v124_v30  ;;  %v123_v35 = vld [vmem:[%s555_s2 + $0x80] sm:$0xf]  ;;  %v366_v36 = vpack.c.bf16 %v121_v33, %v117_v32  ;;  %vm132_vm3 = vcmask 293888   ;;  %s402_s30 = smov [#allocation2]  }
   0xd   :  { %363 = vmatpush1.bf16.msra.mxu0 %v362_v29  ;;  %283 = vmatprep.mubr.f32.mxu0 %v400_v6  ;;  %v126_v37 = vld [vmem:[%s555_s2 + $0x98] sm:$0xf]  ;;  %v125_v38 = vld [vmem:[%s555_s2 + $0x90] sm:$0xf]  ;;  %v295_v39 = vld [vmem:[%s556_s3] sm:$0x3] }
   0xe   :  { %365 = vmatprep.subr.bf16.mxu0 %v364_v31  ;;  %v296_v40 = vmax.f32 %v295_v39, 0.0  ;;  %v320_v41 = vld [vmem:[%s554_s1 + $0x20] ss:$0 sm:$0xff]  ;;  %s304_s7 = sshll.u32 %s402_s30, 4  ;;  %s305_s7 = int_to_ptr.vmem [resolvable:$true] %s304_s7 }
   0xf   :  { %323 = vmatpush1.msk.msra.mxu1 %vm135_vm2, %v123_v35  ;;  %s374_s2 = scalar_lea.vmem %s305_s7, 32  ;;  %p379_p1 = scmp.lt.s32.totalorder %s305_s7, %s305_s7 }
  0x10   :  { %324 = vmatmul.mubr.msk.f32.vlgmr.msra.gmra.mrb[0].mxu1 %vm132_vm3, %v106_v34  ;;  %297 = vst [vmem:[%s559_s6] sm:$0x3] %v296_v40  ;;  %p375_p0 = scmp.ne.s32.totalorder %s305_s7, %s374_s2  ;;  %p380_p2 = scmp.lt.s32.totalorder %s374_s2, %s374_s2 }
  0x11   :  { %367 = vmatpush1.bf16.msra.mxu0 %v366_v36 }
  0x12   :  { %325 = vmatprep.subr.msk.mxu0 %vm135_vm2, %v126_v37  ;;  %p381_p3 = por %p380_p2, %p379_p1 }
  0x14   :  { %p382_p4 = pnand %p381_p3, %p375_p0 }
  0x15   :  { %326 = vmatpush1.msk.msra.mxu0 %vm135_vm2, %v125_v38 }
  0x16   :  { %327 = vmatmul.mubr.msk.f32.vlgmr.msra.gmra.mrb[2].mxu0 %vm132_vm3, %v106_v34 }
  0x88   :  { %v130_v45 = vpop.permute.xlu0 %129 }
  0xdf   :  { %v101_v42 = vpop.f32.mrb[0].mxu0 }
  0xe0   :  { %v102_v43 = vadd.f32 %v320_v41, %v101_v42  ;;  %v345_v44 = vpop.f32.mrb[1].mxu0 }
  0xe2   :  { %105 = vst [vmem:[#allocation2] sm:$0x3] %v102_v43 }
  0xe3   :  { %v214_v46 = vpop.f32.mrb[0].mxu1 }
  0xe4   :  { %385 = shalt.err (!%p382_p4)
}
  0xe5   :  { %s386_s1 = scalar_lea.hbm %s557_s4, 32 }
  0xe6   :  { %p387_p5 = scmp.ne.s32.totalorder %s557_s4, %s386_s1  ;;  %p390_p6 = scmp.lt.u32.totalorder %s386_s1, %s557_s4 }
  0xe8   :  { %p392_p7 = pnand %p390_p6, %p387_p5 }
  0xea   :  { %395 = shalt.err (!%p392_p7)
}
  0xeb   :  { %307 = dma.vmem_to_hbm [thread:$0]  %s305_s7, 32, %s557_s4, [#allocation3]   ;;  %v215_v47 = vadd.f32 %v214_v46, %v130_v45  ;;  %v216_v48 = vpop.f32.mrb[1].mxu1  ;;  %v285_v50 = vpop.f32.mrb[2].mxu0 }
  0xec   :  { %v217_v49 = vadd.f32 %v216_v48, %v130_v45  ;;  %v286_v51 = vadd.f32 %v285_v50, %v130_v45  ;;  %v287_v52 = vpop.f32.mrb[3].mxu0 }
  0xed   :  { %290 = vst [vmem:[%s558_s5] sm:$0xff] %v215_v47  ;;  %v288_v53 = vadd.f32 %v287_v52, %v130_v45 }
  0xee   :  { %291 = vst [vmem:[%s558_s5 + $0x8] sm:$0xff] %v217_v49  ;;  %328 = vst [vmem:[%s558_s5 + $0x10] sm:$0xff] %v286_v51 }
  0xef   :  { %329 = vst [vmem:[%s558_s5 + $0x18] sm:$0xff] %v288_v53 }
  0xf0   :  { %396 = dma.done.wait [#allocation3], 32  }
  0xf1   :  { %397 = vsyncadd [#allocation3], 4294967264 }
  0xf2   :  { %319 = vsyncpa [#allocation3], 1 }

</bundles_post_ra>
